<compile_context>
chip_gen: v5e
topology: v5e:2x2
jax: 0.10.0
libtpu: 0.0.40
codegen_flags: <defaults>
</compile_context>

<pallas_src>
import functools

import jax
import jax.numpy as jnp
from jax.experimental import pallas as pl
from jax.experimental.pallas import tpu as pltpu

EPS = 1e-5


def _vmem_limit_bytes():
    """Generation-aware scoped-VMEM budget: ~80 MiB on 128-MiB parts (v5e/v6e),
    32 MiB on 64-MiB parts (v7x). Falls back to a safe 32 MiB."""
    try:
        cap = pltpu.get_tpu_info().vmem_capacity_bytes
        return 80 * 1024 * 1024 if cap >= 100 * 1024 * 1024 else 32 * 1024 * 1024
    except Exception:  # best-effort hardware query
        return 32 * 1024 * 1024


# ----------------------------- Pallas kernels ---------------------------------
def _matmul_stats_kernel(p_ref, w_ref, y_ref, sum_ref, ssq_ref):
    """Pass A: conv-as-matmul (bf16 in, f32 acc) + partial BN statistics.

    p_ref:   (TILE_M, Kp)  bf16 im2col patches (zero rows for M padding)
    w_ref:   (Kp, Cp)      bf16 flattened conv weight (same block every step)
    y_ref:   (TILE_M, Cp)  bf16 pre-BN activation tile (cast once from the f32 acc)
    sum_ref: (8, Cp)       f32 per-core running partial per-channel sums
    ssq_ref: (8, Cp)       f32 per-core running partial per-channel sum(y^2)
    """
    y = jnp.dot(p_ref[...], w_ref[...], preferred_element_type=jnp.float32)
    y_ref[...] = y.astype(y_ref.dtype)

    # Reduce rows only down to 8 sublane-rows: pure vreg adds on the VPU (no XLU on
    # the per-tile critical path); the final 8->1 collapse happens in the finalize.
    yr = y.reshape(-1, 8, y.shape[-1])
    s = jnp.sum(yr, axis=0)
    ss = jnp.sum(yr * yr, axis=0)

    @pl.when(pl.program_id(1) == 0)
    def _():
        sum_ref[...] = s
        ssq_ref[...] = ss

    @pl.when(pl.program_id(1) != 0)
    def _():
        sum_ref[...] += s
        ssq_ref[...] += ss


def _affine_kernel(apply_relu, mode, *refs):
    """Pass B: out = y*scale + shift (+ identity) (+ ReLU); bf16 in / bf16 out.

    mode 0: no residual                      refs = (y, s, t, o)
    mode 1: plain identity residual          refs = (y, s, t, idn, o)
    mode 2: fused downsample BN residual     refs = (y, s, t, yd, sd, td, o)
    """
    if mode == 2:
        y_ref, s_ref, t_ref, yd_ref, sd_ref, td_ref, o_ref = refs
    elif mode == 1:
        y_ref, s_ref, t_ref, idn_ref, o_ref = refs
    else:
        y_ref, s_ref, t_ref, o_ref = refs

    out = y_ref[...].astype(jnp.float32) * s_ref[...] + t_ref[...]
    if mode == 2:
        out = out + (yd_ref[...].astype(jnp.float32) * sd_ref[...] + td_ref[...])
    elif mode == 1:
        out = out + idn_ref[...].astype(jnp.float32)
    if apply_relu:
        out = jnp.maximum(out, 0.0)
    o_ref[...] = out.astype(o_ref.dtype)


# ------------------------------ conv + BN stats --------------------------------
def conv_stats(patches, w_flat, gamma_p, beta_p, m_true, *, tile_m, core_split,
               vmem_limit):
    """Pass A + finalize.

    patches: (M_pad, Kp) bf16; w_flat: (Kp, Cp) bf16; gamma/beta padded to Cp (f32).
    Returns (y bf16 (M_pad, Cp), scale f32 (1, Cp), shift f32 (1, Cp)). BN uses
    training-mode batch statistics over the m_true real rows (padded rows are zero
    and contribute nothing to the sums)."""
    M_pad, Kp = patches.shape
    Cp = w_flat.shape[1]
    assert tile_m % 8 == 0 and M_pad % (tile_m * core_split) == 0
    gm_per = M_pad // (tile_m * core_split)

    y, ssum, ssq = pl.pallas_call(
        _matmul_stats_kernel,
        out_shape=(jax.ShapeDtypeStruct((M_pad, Cp), jnp.bfloat16),
                   jax.ShapeDtypeStruct((core_split * 8, Cp), jnp.float32),
                   jax.ShapeDtypeStruct((core_split * 8, Cp), jnp.float32)),
        grid=(core_split, gm_per),
        in_specs=[pl.BlockSpec((tile_m, Kp), lambda c, i: (c * gm_per + i, 0)),
                  # TODO(synk): pipeline_mode=pl.Buffered(1) on this constant-index
                  # weight block would drop its redundant second VMEM buffer; omitted
                  # to stay conservative about auto-pipeliner support.
                  pl.BlockSpec((Kp, Cp), lambda c, i: (0, 0))],
        out_specs=(pl.BlockSpec((tile_m, Cp), lambda c, i: (c * gm_per + i, 0)),
                   pl.BlockSpec((8, Cp), lambda c, i: (c, 0)),
                   pl.BlockSpec((8, Cp), lambda c, i: (c, 0))),
        compiler_params=pltpu.CompilerParams(
            # Outer axis: independent halves with their OWN partial-stat rows, so it
            # is safe to shard across v7x's two TensorCores. Inner axis accumulates
            # into the resident stat blocks -> must stay "arbitrary".
            dimension_semantics=("parallel", "arbitrary"),
            vmem_limit_bytes=vmem_limit),
    )(patches, w_flat)

    # Finalize BN scale/shift once per channel (tiny (Cp,) computation).
    # TODO(synk): variance via E[y^2]-E[y]^2 can cancel if |mean| >> std for a channel;
    # switch to shifted/Welford accumulation if BN accuracy beyond ~1e-2 rel. matters.
    mean = jnp.sum(ssum, axis=0) / m_true
    var = jnp.maximum(jnp.sum(ssq, axis=0) / m_true - mean * mean, 0.0)
    scale = gamma_p * jax.lax.rsqrt(var + EPS)
    shift = beta_p - mean * scale
    return y, scale.reshape(1, Cp), shift.reshape(1, Cp)


def affine_pass(y, scale, shift, *, tile_m, vmem_limit, apply_relu=True,
                identity=None, id_scale=None, id_shift=None):
    """Pass B: tiled fused normalize (+residual) (+ReLU); bf16 in / bf16 out."""
    M_pad, Cp = y.shape
    assert M_pad % tile_m == 0
    grid_m = M_pad // tile_m
    mode = 0 if identity is None else (2 if id_scale is not None else 1)

    tile_spec = pl.BlockSpec((tile_m, Cp), lambda i: (i, 0))
    chan_spec = pl.BlockSpec((1, Cp), lambda i: (0, 0))
    args = [y, scale, shift]
    in_specs = [tile_spec, chan_spec, chan_spec]
    if mode == 2:
        args += [identity, id_scale, id_shift]
        in_specs += [tile_spec, chan_spec, chan_spec]
    elif mode == 1:
        args.append(identity)
        in_specs.append(tile_spec)

    return pl.pallas_call(
        functools.partial(_affine_kernel, apply_relu, mode),
        out_shape=jax.ShapeDtypeStruct((M_pad, Cp), jnp.bfloat16),
        grid=(grid_m,),
        in_specs=in_specs,
        out_specs=tile_spec,
        compiler_params=pltpu.CompilerParams(
            dimension_semantics=("parallel",),   # independent tiles -> megacore
            vmem_limit_bytes=vmem_limit),
    )(*args)


# ------------------------------- JAX glue -------------------------------------
def _round_up(x, m):
    return (x + m - 1) // m * m


def _pad_2d(a, rows, cols):
    return jnp.pad(a, ((0, rows - a.shape[0]), (0, cols - a.shape[1])))


def _im2col(x_nhwc, ksize, stride, pad):
    """bf16 unfold (dtype preserved): (N,H,W,C) -> ((N*Ho*Wo), k*k*C), order (dy,dx,cin)."""
    if pad:
        x_nhwc = jnp.pad(x_nhwc, ((0, 0), (pad, pad), (pad, pad), (0, 0)))
    N, Hp, Wp, C = x_nhwc.shape
    Ho = (Hp - ksize) // stride + 1
    Wo = (Wp - ksize) // stride + 1
    cols = []
    for dy in range(ksize):
        for dx in range(ksize):
            cols.append(x_nhwc[:, dy:dy + (Ho - 1) * stride + 1:stride,
                               dx:dx + (Wo - 1) * stride + 1:stride, :])
    p = jnp.concatenate(cols, axis=-1)
    return p.reshape(N * Ho * Wo, ksize * ksize * C), Ho, Wo


def prepare_params(params, cin, cout, stride, dtype=jnp.bfloat16):
    """Run once, outside jit: flatten conv weights to (Kp, Cp) bf16 (K, Cout padded to
    multiples of 128 for lane-dense MXU tiles) and zero-pad BN params to Cp."""
    cp = _round_up(cout, 128)

    def flat_pad_w(w_oihw):
        co, ci, kh, kw = w_oihw.shape
        wf = jnp.transpose(w_oihw, (2, 3, 1, 0)).reshape(kh * kw * ci, co)  # (K, Cout)
        kp = _round_up(kh * kw * ci, 128)
        return _pad_2d(wf, kp, cp).astype(dtype)

    def pad_vec(v):
        return jnp.pad(v, (0, cp - cout)).astype(jnp.float32)

    prep = {
        "w1": flat_pad_w(params["w1"]), "w2": flat_pad_w(params["w2"]),
        "g1": pad_vec(params["g1"]), "b1": pad_vec(params["b1"]),
        "g2": pad_vec(params["g2"]), "b2": pad_vec(params["b2"]),
    }
    if stride != 1 or cin != cout:
        prep["wd"] = flat_pad_w(params["wd"])
        prep["gd"] = pad_vec(params["gd"])
        prep["betad"] = pad_vec(params["betad"])
        # Downsample conv bias ("bd") intentionally dropped: it cancels under
        # training-mode BatchNorm (see header note).
    return prep


def resnet_block_forward(x_nchw, prep, stride, cout, *, tile_m=512, core_split=2):
    N, Cin, H, W = x_nchw.shape
    cp = prep["g1"].shape[0]
    vmem_limit = _vmem_limit_bytes()

    # NHWC + bf16 BEFORE the unfold: the 9x-inflated patch matrices are built and
    # streamed at 2 B/elt instead of 4.
    x = jnp.transpose(x_nchw, (0, 2, 3, 1)).astype(jnp.bfloat16)

    # conv1 (3x3, stride, pad=1, no bias) + bn1 + relu
    p1, Ho, Wo = _im2col(x, 3, stride, 1)
    m_true = N * Ho * Wo
    m_pad = _round_up(m_true, tile_m * core_split)
    p1 = _pad_2d(p1, m_pad, prep["w1"].shape[0])
    y1, s1, t1 = conv_stats(p1, prep["w1"], prep["g1"], prep["b1"], m_true,
                            tile_m=tile_m, core_split=core_split,
                            vmem_limit=vmem_limit)
    out1 = affine_pass(y1, s1, t1, tile_m=tile_m, vmem_limit=vmem_limit,
                       apply_relu=True)

    # identity: plain bf16 passthrough, or downsample (1x1 conv stride s + BN) whose
    # normalized result is NOT materialized — its (y_d, scale_d, shift_d) are folded
    # straight into conv2's Pass B below.
    has_ds = (stride != 1 or Cin != cout)
    if has_ds:
        pd, _, _ = _im2col(x, 1, stride, 0)       # 1x1 conv: no patch inflation
        pd = _pad_2d(pd, m_pad, prep["wd"].shape[0])
        yd, sd, td = conv_stats(pd, prep["wd"], prep["gd"], prep["betad"], m_true,
                                tile_m=tile_m, core_split=core_split,
                                vmem_limit=vmem_limit)
    else:
        assert Ho == H and Wo == W and Cin == cout   # layout assumption of the reshape
        idn = _pad_2d(x.reshape(m_true, Cin), m_pad, cp)      # bf16 identity

    # conv2 (3x3, stride 1, pad=1, no bias) + bn2 + residual add + relu (all fused)
    out1_img = out1[:m_true, :cout].reshape(N, Ho, Wo, cout)  # already bf16
    p2, _, _ = _im2col(out1_img, 3, 1, 1)
    p2 = _pad_2d(p2, m_pad, prep["w2"].shape[0])
    y2, s2, t2 = conv_stats(p2, prep["w2"], prep["g2"], prep["b2"], m_true,
                            tile_m=tile_m, core_split=core_split,
                            vmem_limit=vmem_limit)
    if has_ds:
        out2 = affine_pass(y2, s2, t2, tile_m=tile_m, vmem_limit=vmem_limit,
                           apply_relu=True, identity=yd, id_scale=sd, id_shift=td)
    else:
        out2 = affine_pass(y2, s2, t2, tile_m=tile_m, vmem_limit=vmem_limit,
                           apply_relu=True, identity=idn)

    out = out2[:m_true, :cout].astype(jnp.float32).reshape(N, Ho, Wo, cout)
    return jnp.transpose(out, (0, 3, 1, 2))       # back to NCHW, f32 like the input


# ---------------------------- pure-JAX reference -------------------------------
def _ref_bn(y_nchw, g, b):
    mean = jnp.mean(y_nchw, axis=(0, 2, 3), keepdims=True)
    var = jnp.mean(jnp.square(y_nchw - mean), axis=(0, 2, 3), keepdims=True)
    return (y_nchw - mean) * jax.lax.rsqrt(var + EPS) * g.reshape(1, -1, 1, 1) \
        + b.reshape(1, -1, 1, 1)


def resnet_block_ref(x_nchw, params, stride):
    conv = lambda x, w, s, p: jax.lax.conv_general_dilated(
        x, w, (s, s), [(p, p), (p, p)],
        dimension_numbers=("NCHW", "OIHW", "NCHW"),
        precision=jax.lax.Precision.HIGHEST)
    Cin = x_nchw.shape[1]
    Cout = params["w1"].shape[0]
    out = conv(x_nchw, params["w1"], stride, 1)
    out = jnp.maximum(_ref_bn(out, params["g1"], params["b1"]), 0.0)
    out = conv(out, params["w2"], 1, 1)
    out = _ref_bn(out, params["g2"], params["b2"])
    if stride != 1 or Cin != Cout:
        identity = conv(x_nchw, params["wd"], stride, 0) + params["bd"].reshape(1, -1, 1, 1)
        identity = _ref_bn(identity, params["gd"], params["betad"])
    else:
        identity = x_nchw
    return jnp.maximum(out + identity, 0.0)


# ----------------------------------- main --------------------------------------
if __name__ == "__main__":
    root_key = jax.random.PRNGKey(0)

    def make_params(key, cin, cout, need_ds):
        ks = jax.random.split(key, 10)
        p = {
            "w1": 0.1 * jax.random.normal(ks[0], (cout, cin, 3, 3), jnp.float32),
            "w2": 0.1 * jax.random.normal(ks[1], (cout, cout, 3, 3), jnp.float32),
            "g1": 1.0 + 0.1 * jax.random.normal(ks[4], (cout,), jnp.float32),
            "b1": 0.1 * jax.random.normal(ks[5], (cout,), jnp.float32),
            "g2": 1.0 + 0.1 * jax.random.normal(ks[6], (cout,), jnp.float32),
            "b2": 0.1 * jax.random.normal(ks[7], (cout,), jnp.float32),
        }
        if need_ds:
            p["wd"] = 0.1 * jax.random.normal(ks[2], (cout, cin, 1, 1), jnp.float32)
            p["bd"] = 0.1 * jax.random.normal(ks[3], (cout,), jnp.float32)
            p["gd"] = 1.0 + 0.1 * jax.random.normal(ks[8], (cout,), jnp.float32)
            p["betad"] = 0.1 * jax.random.normal(ks[9], (cout,), jnp.float32)
        return p

    # small tile + core_split=2 so the multi-tile per-core BN-stat accumulation and
    # the cross-core stat reduction are actually exercised at these small shapes
    fwd = jax.jit(functools.partial(resnet_block_forward, tile_m=64, core_split=2),
                  static_argnums=(2, 3))

    configs = [
        (2, 4, 8, 16, 16, 2),   # stride 2, Cin != Cout  -> fused downsample branch
        (2, 8, 8, 16, 16, 1),   # stride 1, Cin == Cout  -> plain identity branch
    ]

    for idx, (N, Cin, Cout, H, W, stride) in enumerate(configs):
        kp, kx = jax.random.split(jax.random.fold_in(root_key, idx))
        need_ds = (stride != 1 or Cin != Cout)
        params = make_params(kp, Cin, Cout, need_ds)
        prep = prepare_params(params, Cin, Cout, stride)
        x = jax.random.normal(kx, (N, Cin, H, W), jnp.float32)

        out = jax.block_until_ready(fwd(x, prep, stride, Cout))

        ref = resnet_block_ref(x, params, stride)
        assert out.shape == ref.shape == (N, Cout, H // stride, W // stride)
        max_err = float(jnp.max(jnp.abs(out - ref)))
        # bf16 matmul inputs + bf16 intermediates (f32 accumulation/statistics)
        assert jnp.allclose(out, ref, atol=2.5e-2, rtol=2.5e-2), max_err

    print("KERNEL_OK")
</pallas_src>

<mosaic_0001>
module attributes {stable_mosaic.version = 11 : i64} {
  func.func @_matmul_stats_kernel(%arg0: i32, %arg1: i32, %arg2: memref<64x128xbf16, #tpu.memory_space<vmem>>, %arg3: memref<128x128xbf16, #tpu.memory_space<vmem>>, %arg4: memref<64x128xbf16, #tpu.memory_space<vmem>>, %arg5: memref<8x128xf32, #tpu.memory_space<vmem>>, %arg6: memref<8x128xf32, #tpu.memory_space<vmem>>) attributes {dimension_semantics = [#tpu.dimension_semantics<parallel>, #tpu.dimension_semantics<arbitrary>], iteration_bounds = array<i64: 2, 1>, scalar_prefetch = 0 : i64, scratch_operands = 0 : i64, tpu.core_type = #tpu.core_type<tc>, window_params = [{transform_indices = @transform_0, window_bounds = array<i64: 64, 128>}, {pipeline_mode = #tpu.pipeline_mode<synchronous>, transform_indices = @transform_1, window_bounds = array<i64: 128, 128>}, {transform_indices = @transform_2, window_bounds = array<i64: 64, 128>}, {transform_indices = @transform_3, window_bounds = array<i64: 8, 128>}, {transform_indices = @transform_4, window_bounds = array<i64: 8, 128>}]} {
    %c0 = arith.constant 0 : index
    %c0_0 = arith.constant 0 : index
    %0 = vector.load %arg2[%c0, %c0_0] : memref<64x128xbf16, #tpu.memory_space<vmem>>, vector<64x128xbf16>
    %c0_1 = arith.constant 0 : index
    %c0_2 = arith.constant 0 : index
    %1 = vector.load %arg3[%c0_1, %c0_2] : memref<128x128xbf16, #tpu.memory_space<vmem>>, vector<128x128xbf16>
    %cst = arith.constant dense<0.000000e+00> : vector<64x128xf32>
    %2 = tpu.matmul %0, %1, %cst {dimension_numbers = #tpu.dot_dimension_numbers<[1], [0], [0], [1], [0, 0, 1, 1], [], []>} : vector<64x128xbf16>, vector<128x128xbf16>, vector<64x128xf32> -> vector<64x128xf32>
    %3 = arith.truncf %2 : vector<64x128xf32> to vector<64x128xbf16>
    %c0_3 = arith.constant 0 : index
    %c0_4 = arith.constant 0 : index
    %4 = vector.load %arg4[%c0_3, %c0_4] : memref<64x128xbf16, #tpu.memory_space<vmem>>, vector<64x128xbf16>
    tpu.vector_store %arg4[%c0_3, %c0_4], %3 {strides = array<i32>} : memref<64x128xbf16, #tpu.memory_space<vmem>>, vector<64x128xbf16>,
    %5 = vector.shape_cast %2 : vector<64x128xf32> to vector<8x8x128xf32>
    %cst_5 = arith.constant dense<0.000000e+00> : vector<8x128xf32>
    %6 = vector.multi_reduction <add>, %5, %cst_5 [0] : vector<8x8x128xf32> to vector<8x128xf32>
    %7 = arith.mulf %5, %5 : vector<8x8x128xf32>
    %cst_6 = arith.constant dense<0.000000e+00> : vector<8x128xf32>
    %8 = vector.multi_reduction <add>, %7, %cst_6 [0] : vector<8x8x128xf32> to vector<8x128xf32>
    %c0_i32 = arith.constant 0 : i32
    %9 = arith.cmpi eq, %arg1, %c0_i32 : i32
    %10 = arith.extui %9 : i1 to i32
    %c0_i32_7 = arith.constant 0 : i32
    %11 = arith.cmpi ne, %10, %c0_i32_7 : i32
    scf.if %11 {
      %c0_10 = arith.constant 0 : index
      %c0_11 = arith.constant 0 : index
      %15 = vector.load %arg5[%c0_10, %c0_11] : memref<8x128xf32, #tpu.memory_space<vmem>>, vector<8x128xf32>
      tpu.vector_store %arg5[%c0_10, %c0_11], %6 {strides = array<i32>} : memref<8x128xf32, #tpu.memory_space<vmem>>, vector<8x128xf32>,
      %c0_12 = arith.constant 0 : index
      %c0_13 = arith.constant 0 : index
      %16 = vector.load %arg6[%c0_12, %c0_13] : memref<8x128xf32, #tpu.memory_space<vmem>>, vector<8x128xf32>
      tpu.vector_store %arg6[%c0_12, %c0_13], %8 {strides = array<i32>} : memref<8x128xf32, #tpu.memory_space<vmem>>, vector<8x128xf32>,
    } else {
    }
    %c0_i32_8 = arith.constant 0 : i32
    %12 = arith.cmpi ne, %arg1, %c0_i32_8 : i32
    %13 = arith.extui %12 : i1 to i32
    %c0_i32_9 = arith.constant 0 : i32
    %14 = arith.cmpi ne, %13, %c0_i32_9 : i32
    scf.if %14 {
      %c0_10 = arith.constant 0 : index
      %c0_11 = arith.constant 0 : index
      %15 = vector.load %arg5[%c0_10, %c0_11] : memref<8x128xf32, #tpu.memory_space<vmem>>, vector<8x128xf32>
      %16 = arith.addf %15, %6 : vector<8x128xf32>
      %c0_12 = arith.constant 0 : index
      %c0_13 = arith.constant 0 : index
      %17 = vector.load %arg5[%c0_12, %c0_13] : memref<8x128xf32, #tpu.memory_space<vmem>>, vector<8x128xf32>
      tpu.vector_store %arg5[%c0_12, %c0_13], %16 {strides = array<i32>} : memref<8x128xf32, #tpu.memory_space<vmem>>, vector<8x128xf32>,
      %c0_14 = arith.constant 0 : index
      %c0_15 = arith.constant 0 : index
      %18 = vector.load %arg6[%c0_14, %c0_15] : memref<8x128xf32, #tpu.memory_space<vmem>>, vector<8x128xf32>
      %19 = arith.addf %18, %8 : vector<8x128xf32>
      %c0_16 = arith.constant 0 : index
      %c0_17 = arith.constant 0 : index
      %20 = vector.load %arg6[%c0_16, %c0_17] : memref<8x128xf32, #tpu.memory_space<vmem>>, vector<8x128xf32>
      tpu.vector_store %arg6[%c0_16, %c0_17], %19 {strides = array<i32>} : memref<8x128xf32, #tpu.memory_space<vmem>>, vector<8x128xf32>,
    } else {
    }
    return
  }
  func.func @transform_0(%arg0: i32, %arg1: i32) -> (i32, i32) {
    %c1_i32 = arith.constant 1 : i32
    %0 = arith.muli %arg0, %c1_i32 : i32
    %1 = arith.addi %0, %arg1 : i32
    %c0_i32 = arith.constant 0 : i32
    %c0_i32_0 = arith.constant 0 : i32
    return %1, %c0_i32 : i32, i32
  }
  func.func @transform_1(%arg0: i32, %arg1: i32) -> (i32, i32) {
    %c0_i32 = arith.constant 0 : i32
    %c0_i32_0 = arith.constant 0 : i32
    %c0_i32_1 = arith.constant 0 : i32
    return %c0_i32, %c0_i32_0 : i32, i32
  }
  func.func @transform_2(%arg0: i32, %arg1: i32) -> (i32, i32) {
    %c1_i32 = arith.constant 1 : i32
    %0 = arith.muli %arg0, %c1_i32 : i32
    %1 = arith.addi %0, %arg1 : i32
    %c0_i32 = arith.constant 0 : i32
    %c0_i32_0 = arith.constant 0 : i32
    return %1, %c0_i32 : i32, i32
  }
  func.func @transform_3(%arg0: i32, %arg1: i32) -> (i32, i32) {
    %c0_i32 = arith.constant 0 : i32
    %c0_i32_0 = arith.constant 0 : i32
    return %arg0, %c0_i32 : i32, i32
  }
  func.func @transform_4(%arg0: i32, %arg1: i32) -> (i32, i32) {
    %c0_i32 = arith.constant 0 : i32
    %c0_i32_0 = arith.constant 0 : i32
    return %arg0, %c0_i32 : i32, i32
  }
}

module attributes {stable_mosaic.version = 11 : i64} {
  func.func @_affine_kernel(%arg0: i32, %arg1: memref<64x128xbf16, #tpu.memory_space<vmem>>, %arg2: memref<1x128xf32, #tpu.memory_space<vmem>>, %arg3: memref<1x128xf32, #tpu.memory_space<vmem>>, %arg4: memref<64x128xbf16, #tpu.memory_space<vmem>>) attributes {dimension_semantics = [#tpu.dimension_semantics<parallel>], iteration_bounds = array<i64: 2>, scalar_prefetch = 0 : i64, scratch_operands = 0 : i64, tpu.core_type = #tpu.core_type<tc>, window_params = [{transform_indices = @transform_0, window_bounds = array<i64: 64, 128>}, {pipeline_mode = #tpu.pipeline_mode<synchronous>, transform_indices = @transform_1, window_bounds = array<i64: 1, 128>}, {pipeline_mode = #tpu.pipeline_mode<synchronous>, transform_indices = @transform_2, window_bounds = array<i64: 1, 128>}, {transform_indices = @transform_3, window_bounds = array<i64: 64, 128>}]} {
    %c0 = arith.constant 0 : index
    %c0_0 = arith.constant 0 : index
    %0 = vector.load %arg1[%c0, %c0_0] : memref<64x128xbf16, #tpu.memory_space<vmem>>, vector<64x128xbf16>
    %1 = arith.extf %0 : vector<64x128xbf16> to vector<64x128xf32>
    %c0_1 = arith.constant 0 : index
    %c0_2 = arith.constant 0 : index
    %2 = vector.load %arg2[%c0_1, %c0_2] : memref<1x128xf32, #tpu.memory_space<vmem>>, vector<1x128xf32>
    %3 = vector.broadcast %2 : vector<1x128xf32> to vector<64x128xf32>
    %4 = arith.mulf %1, %3 : vector<64x128xf32>
    %c0_3 = arith.constant 0 : index
    %c0_4 = arith.constant 0 : index
    %5 = vector.load %arg3[%c0_3, %c0_4] : memref<1x128xf32, #tpu.memory_space<vmem>>, vector<1x128xf32>
    %6 = vector.broadcast %5 : vector<1x128xf32> to vector<64x128xf32>
    %7 = arith.addf %4, %6 : vector<64x128xf32>
    %cst = arith.constant 0.000000e+00 : f32
    %8 = vector.broadcast %cst : f32 to vector<64x128xf32>
    %9 = arith.maximumf %7, %8 : vector<64x128xf32>
    %10 = arith.truncf %9 : vector<64x128xf32> to vector<64x128xbf16>
    %c0_5 = arith.constant 0 : index
    %c0_6 = arith.constant 0 : index
    %11 = vector.load %arg4[%c0_5, %c0_6] : memref<64x128xbf16, #tpu.memory_space<vmem>>, vector<64x128xbf16>
    tpu.vector_store %arg4[%c0_5, %c0_6], %10 {strides = array<i32>} : memref<64x128xbf16, #tpu.memory_space<vmem>>, vector<64x128xbf16>,
    return
  }
  func.func @transform_0(%arg0: i32) -> (i32, i32) {
    %c0_i32 = arith.constant 0 : i32
    %c0_i32_0 = arith.constant 0 : i32
    return %arg0, %c0_i32 : i32, i32
  }
  func.func @transform_1(%arg0: i32) -> (i32, i32) {
    %c0_i32 = arith.constant 0 : i32
    %c0_i32_0 = arith.constant 0 : i32
    %c0_i32_1 = arith.constant 0 : i32
    return %c0_i32, %c0_i32_0 : i32, i32
  }
  func.func @transform_2(%arg0: i32) -> (i32, i32) {
    %c0_i32 = arith.constant 0 : i32
    %c0_i32_0 = arith.constant 0 : i32
    %c0_i32_1 = arith.constant 0 : i32
    return %c0_i32, %c0_i32_0 : i32, i32
  }
  func.func @transform_3(%arg0: i32) -> (i32, i32) {
    %c0_i32 = arith.constant 0 : i32
    %c0_i32_0 = arith.constant 0 : i32
    return %arg0, %c0_i32 : i32, i32
  }
}

module attributes {stable_mosaic.version = 11 : i64} {
  func.func @_affine_kernel(%arg0: i32, %arg1: memref<64x128xbf16, #tpu.memory_space<vmem>>, %arg2: memref<1x128xf32, #tpu.memory_space<vmem>>, %arg3: memref<1x128xf32, #tpu.memory_space<vmem>>, %arg4: memref<64x128xbf16, #tpu.memory_space<vmem>>, %arg5: memref<1x128xf32, #tpu.memory_space<vmem>>, %arg6: memref<1x128xf32, #tpu.memory_space<vmem>>, %arg7: memref<64x128xbf16, #tpu.memory_space<vmem>>) attributes {dimension_semantics = [#tpu.dimension_semantics<parallel>], iteration_bounds = array<i64: 2>, scalar_prefetch = 0 : i64, scratch_operands = 0 : i64, tpu.core_type = #tpu.core_type<tc>, window_params = [{transform_indices = @transform_0, window_bounds = array<i64: 64, 128>}, {pipeline_mode = #tpu.pipeline_mode<synchronous>, transform_indices = @transform_1, window_bounds = array<i64: 1, 128>}, {pipeline_mode = #tpu.pipeline_mode<synchronous>, transform_indices = @transform_2, window_bounds = array<i64: 1, 128>}, {transform_indices = @transform_3, window_bounds = array<i64: 64, 128>}, {pipeline_mode = #tpu.pipeline_mode<synchronous>, transform_indices = @transform_4, window_bounds = array<i64: 1, 128>}, {pipeline_mode = #tpu.pipeline_mode<synchronous>, transform_indices = @transform_5, window_bounds = array<i64: 1, 128>}, {transform_indices = @transform_6, window_bounds = array<i64: 64, 128>}]} {
    %c0 = arith.constant 0 : index
    %c0_0 = arith.constant 0 : index
    %0 = vector.load %arg1[%c0, %c0_0] : memref<64x128xbf16, #tpu.memory_space<vmem>>, vector<64x128xbf16>
    %1 = arith.extf %0 : vector<64x128xbf16> to vector<64x128xf32>
    %c0_1 = arith.constant 0 : index
    %c0_2 = arith.constant 0 : index
    %2 = vector.load %arg2[%c0_1, %c0_2] : memref<1x128xf32, #tpu.memory_space<vmem>>, vector<1x128xf32>
    %3 = vector.broadcast %2 : vector<1x128xf32> to vector<64x128xf32>
    %4 = arith.mulf %1, %3 : vector<64x128xf32>
    %c0_3 = arith.constant 0 : index
    %c0_4 = arith.constant 0 : index
    %5 = vector.load %arg3[%c0_3, %c0_4] : memref<1x128xf32, #tpu.memory_space<vmem>>, vector<1x128xf32>
    %6 = vector.broadcast %5 : vector<1x128xf32> to vector<64x128xf32>
    %7 = arith.addf %4, %6 : vector<64x128xf32>
    %c0_5 = arith.constant 0 : index
    %c0_6 = arith.constant 0 : index
    %8 = vector.load %arg4[%c0_5, %c0_6] : memref<64x128xbf16, #tpu.memory_space<vmem>>, vector<64x128xbf16>
    %9 = arith.extf %8 : vector<64x128xbf16> to vector<64x128xf32>
    %c0_7 = arith.constant 0 : index
    %c0_8 = arith.constant 0 : index
    %10 = vector.load %arg5[%c0_7, %c0_8] : memref<1x128xf32, #tpu.memory_space<vmem>>, vector<1x128xf32>
    %11 = vector.broadcast %10 : vector<1x128xf32> to vector<64x128xf32>
    %12 = arith.mulf %9, %11 : vector<64x128xf32>
    %c0_9 = arith.constant 0 : index
    %c0_10 = arith.constant 0 : index
    %13 = vector.load %arg6[%c0_9, %c0_10] : memref<1x128xf32, #tpu.memory_space<vmem>>, vector<1x128xf32>
    %14 = vector.broadcast %13 : vector<1x128xf32> to vector<64x128xf32>
    %15 = arith.addf %12, %14 : vector<64x128xf32>
    %16 = arith.addf %7, %15 : vector<64x128xf32>
    %cst = arith.constant 0.000000e+00 : f32
    %17 = vector.broadcast %cst : f32 to vector<64x128xf32>
    %18 = arith.maximumf %16, %17 : vector<64x128xf32>
    %19 = arith.truncf %18 : vector<64x128xf32> to vector<64x128xbf16>
    %c0_11 = arith.constant 0 : index
    %c0_12 = arith.constant 0 : index
    %20 = vector.load %arg7[%c0_11, %c0_12] : memref<64x128xbf16, #tpu.memory_space<vmem>>, vector<64x128xbf16>
    tpu.vector_store %arg7[%c0_11, %c0_12], %19 {strides = array<i32>} : memref<64x128xbf16, #tpu.memory_space<vmem>>, vector<64x128xbf16>,
    return
  }
  func.func @transform_0(%arg0: i32) -> (i32, i32) {
    %c0_i32 = arith.constant 0 : i32
    %c0_i32_0 = arith.constant 0 : i32
    return %arg0, %c0_i32 : i32, i32
  }
  func.func @transform_1(%arg0: i32) -> (i32, i32) {
    %c0_i32 = arith.constant 0 : i32
    %c0_i32_0 = arith.constant 0 : i32
    %c0_i32_1 = arith.constant 0 : i32
    return %c0_i32, %c0_i32_0 : i32, i32
  }
  func.func @transform_2(%arg0: i32) -> (i32, i32) {
    %c0_i32 = arith.constant 0 : i32
    %c0_i32_0 = arith.constant 0 : i32
    %c0_i32_1 = arith.constant 0 : i32
    return %c0_i32, %c0_i32_0 : i32, i32
  }
  func.func @transform_3(%arg0: i32) -> (i32, i32) {
    %c0_i32 = arith.constant 0 : i32
    %c0_i32_0 = arith.constant 0 : i32
    return %arg0, %c0_i32 : i32, i32
  }
  func.func @transform_4(%arg0: i32) -> (i32, i32) {
    %c0_i32 = arith.constant 0 : i32
    %c0_i32_0 = arith.constant 0 : i32
    %c0_i32_1 = arith.constant 0 : i32
    return %c0_i32, %c0_i32_0 : i32, i32
  }
  func.func @transform_5(%arg0: i32) -> (i32, i32) {
    %c0_i32 = arith.constant 0 : i32
    %c0_i32_0 = arith.constant 0 : i32
    %c0_i32_1 = arith.constant 0 : i32
    return %c0_i32, %c0_i32_0 : i32, i32
  }
  func.func @transform_6(%arg0: i32) -> (i32, i32) {
    %c0_i32 = arith.constant 0 : i32
    %c0_i32_0 = arith.constant 0 : i32
    return %arg0, %c0_i32 : i32, i32
  }
}

</mosaic_0001>

<bundles_post_ra>
// kernel: resnet_block_forward.6
= control target key start
LH: loop header
LB: loop body
LE: loop exit
PB: predicated region body
PF: predicated region fallthrough
CT: control target
= control target key end

     0   :  { %s385_s12 = smov 0   ;;  %s415_s0 = inlined_call_operand.vmem [shape: bf16[128,128], index: 0, kind: input, shape index: {}]   ;;  %s416_s1 = inlined_call_operand.vmem [shape: f32[1,128], index: 1, kind: input, shape index: {}]   ;;  %s417_s2 = inlined_call_operand.vmem [shape: f32[1,128], index: 2, kind: input, shape index: {}]   ;;  %s418_s3 = inlined_call_operand.vmem [shape: bf16[128,128], index: 3, kind: output, shape index: {}]  }
   0x1 LB: > { %s294_s13 = sadd.s32 4294967295, %s363_s12   ;;  %p298_p0 = scmp.ge.s32.totalorder %s363_s12, 1  ;;  %s363_s12 = sphi %s385_s12, %s13_s12  }
   0x2   : > { %p138_p1 = scmp.lt.s32.totalorder %s363_s12, 3 }
   0x4   : > { %p139_p2 = pnand %p298_p0, %p138_p1 }
   0x5   : > { %s299_s14 = sshll.u32 (!%p139_p2), %s294_s13, 3 }
   0x6   : > { %142 = sbr.rel (%p139_p2) target bundleno = 29 (0x1d), region = 32  ;;  %p163_p3 = scmp.lt.s32.totalorder (!%p139_p2), %s299_s14, 15 }
   0xb   : > { %s420_s14 = smov (!%p163_p3, %s299_s14), 15  ;;  %v355_v0 = vld [vmem:[%s416_s1] ss:$0 sm:$0xff] }
   0xc   : > { %s300_s15 = sshll.u32 %s420_s14, 2  ;;  %v356_v6 = vld [vmem:[%s417_s2] ss:$0 sm:$0xff] }
   0xd   : > { %s166_s18 = scalar_lea.vmem %s415_s0, %s300_s15  ;;  %s172_s25 = scalar_lea.vmem %s418_s3, %s300_s15 }
   0xe   : > { %v306_v1 = vld [vmem:[%s166_s18] sm:$0xff]   ;;  %v341_v2 = vld [vmem:[%s166_s18 + $0x8] sm:$0xff]   ;;  %v342_v3 = vld [vmem:[%s166_s18 + $0x10] sm:$0xff]  }
   0xf   : > { %v307_v4 = vunpack.c.l.bf16 %v306_v1  ;;  %v308_v5 = vunpack.c.h.bf16 %v306_v1  ;;  %v311_v7 = vunpack.c.l.bf16 %v341_v2  ;;  %v312_v8 = vunpack.c.h.bf16 %v341_v2  ;;  %v343_v9 = vld [vmem:[%s166_s18 + $0x18] sm:$0xff]  }
  0x10   : > { %v315_v10 = vunpack.c.l.bf16 %v342_v3  ;;  %v316_v11 = vunpack.c.h.bf16 %v342_v3  ;;  %v319_v12 = vunpack.c.l.bf16 %v343_v9  ;;  %v320_v13 = vunpack.c.h.bf16 %v343_v9 }
  0x11   : > { %v194_v14 = vmul.f32 %v355_v0, %v307_v4  ;;  %v195_v15 = vmul.f32 %v355_v0, %v308_v5  ;;  %v196_v16 = vmul.f32 %v355_v0, %v311_v7  ;;  %v197_v17 = vmul.f32 %v355_v0, %v312_v8 }
  0x12   : > { %v198_v18 = vmul.f32 %v355_v0, %v315_v10  ;;  %v199_v19 = vmul.f32 %v355_v0, %v316_v11  ;;  %v200_v20 = vmul.f32 %v355_v0, %v319_v12  ;;  %v201_v21 = vmul.f32 %v355_v0, %v320_v13 }
  0x13   : > { %v206_v22 = vadd.f32 %v356_v6, %v194_v14  ;;  %v207_v23 = vadd.f32 %v356_v6, %v195_v15  ;;  %v208_v24 = vadd.f32 %v356_v6, %v196_v16  ;;  %v209_v25 = vadd.f32 %v356_v6, %v197_v17 }
  0x14   : > { %v210_v26 = vadd.f32 %v356_v6, %v198_v18  ;;  %v211_v27 = vadd.f32 %v356_v6, %v199_v19  ;;  %v212_v28 = vadd.f32 %v356_v6, %v200_v20  ;;  %v213_v29 = vadd.f32 %v356_v6, %v201_v21 }
  0x15   : > { %v214_v30 = vmax.f32 %v206_v22, 0.0  ;;  %v215_v31 = vmax.f32 %v207_v23, 0.0  ;;  %v216_v32 = vmax.f32 %v208_v24, 0.0  ;;  %v217_v33 = vmax.f32 %v209_v25, 0.0 }
  0x16   : > { %v218_v34 = vmax.f32 %v210_v26, 0.0  ;;  %v219_v35 = vmax.f32 %v211_v27, 0.0  ;;  %v220_v36 = vmax.f32 %v212_v28, 0.0  ;;  %v221_v37 = vmax.f32 %v213_v29, 0.0 }
  0x17   : > { %v324_v38 = vpack.c.bf16 %v215_v31, %v214_v30  ;;  %v329_v39 = vpack.c.bf16 %v217_v33, %v216_v32 }
  0x18   : > { %v334_v40 = vpack.c.bf16 %v219_v35, %v218_v34  ;;  %v339_v41 = vpack.c.bf16 %v221_v37, %v220_v36 }
  0x19   : > { %325 = vst [vmem:[%s172_s25] sm:$0xff] %v324_v38  }
  0x1a   : > { %344 = vst [vmem:[%s172_s25 + $0x8] sm:$0xff] %v329_v39  }
  0x1b   : > { %345 = vst [vmem:[%s172_s25 + $0x10] sm:$0xff] %v334_v40  }
  0x1c   : > { %346 = vst [vmem:[%s172_s25 + $0x18] sm:$0xff] %v339_v41  }
  0x1d PF: > { %s13_s12 = sadd.s32 1, %s363_s12  }
  0x1e   : > { %p10_p4 = scmp.ge.s32.totalorder %s13_s12, 4  }
  0x20   :  { %12 = sbr.rel (!%p10_p4) target bundleno = 1 (0x1), region = 62 }

// kernel: resnet_block_forward.5
= control target key start
LH: loop header
LB: loop body
LE: loop exit
PB: predicated region body
PF: predicated region fallthrough
CT: control target
= control target key end

     0   :  { %s748_s15 = smov 0   ;;  %s750_s16 = smov 0   ;;  %s825_s0 = inlined_call_operand.vmem [shape: bf16[128,128], index: 0, kind: input, shape index: {}]   ;;  %s826_s1 = inlined_call_operand.vmem [shape: bf16[128,128], index: 1, kind: input, shape index: {}]   ;;  %s827_s2 = inlined_call_operand.vmem [shape: bf16[128,128], index: 2, kind: output, shape index: {0}]   ;;  %s828_s3 = inlined_call_operand.vmem [shape: f32[16,128], index: 3, kind: output, shape index: {1}]   ;;  %s829_s4 = inlined_call_operand.vmem [shape: f32[16,128], index: 4, kind: output, shape index: {2}]  }
   0x1   :  { %s752_s17 = smov 0  }
   0x2 LB: > { %s27_s18 = sadd.s32 1, %s717_s16  ;;  %p559_p0 = scmp.ge.s32.totalorder %s721_s17, 1  ;;  %s721_s17 = sphi %s752_s17, %s15_s17   ;;  %s717_s16 = sphi %s750_s16, %s831_s16   ;;  %s713_s15 = sphi %s748_s15, %s830_s15  }
   0x3   : > { %p29_p1 = scmp.ge.s32.totalorder %s27_s18, 2  ;;  %p186_p2 = scmp.lt.s32.totalorder %s721_s17, 3 }
   0x5   : > { %s833_s18 = smov (%p29_p1, %s27_s18), 0  ;;  %p187_p3 = pnand %p559_p0, %p186_p2 }
   0x6   : > { %s560_s27 = sshll.u32 (!%p187_p3), %s713_s15, 3  ;;  %p238_p5 = scmp.lt.s32.totalorder (!%p187_p3), %s713_s15, 1 }
   0x7   : > { %190 = sbr.rel (%p187_p3) target bundleno = 195 (0xc3), region = 28  ;;  %p224_p4 = scmp.lt.s32.totalorder (!%p187_p3), %s560_s27, 15 }
   0xc   : > { %v627_v0 = vld [vmem:[%s826_s1 + $0x38] sm:$0xff]  ;;  %v626_v1 = vld [vmem:[%s826_s1 + $0x30] sm:$0xff]  ;;  %v625_v2 = vld [vmem:[%s826_s1 + $0x28] sm:$0xff]  ;;  %s835_s27 = smov (!%p224_p4, %s560_s27), 15  ;;  %s837_s15 = smov (!%p238_p5, %s713_s15), 1 }
   0xd   : > { %342 = vmatpush.bf16.msra.mxu0 %v627_v0  ;;  %651 = vmatpush.bf16.msra.mxu1 %v627_v0  ;;  %v624_v3 = vld [vmem:[%s826_s1 + $0x20] sm:$0xff]  ;;  %v623_v4 = vld [vmem:[%s826_s1 + $0x18] sm:$0xff]  ;;  %v622_v5 = vld [vmem:[%s826_s1 + $0x10] sm:$0xff]  ;;  %s561_s8 = sshll.u32 %s835_s27, 2  ;;  %s564_s21 = sshll.u32 %s837_s15, 3 }
   0xe   : > { %652 = vmatpush.bf16.msra.mxu2 %v627_v0  ;;  %653 = vmatpush.bf16.msra.mxu3 %v627_v0  ;;  %v621_v6 = vld [vmem:[%s826_s1 + $0x8] sm:$0xff]  ;;  %v620_v7 = vld [vmem:[%s826_s1] sm:$0xff]  ;;  %s227_s13 = scalar_lea.vmem %s825_s0, %s561_s8  ;;  %s802_s20 = scalar_lea.vmem %s827_s2, %s561_s8 }
   0xf   : > { %v616_v8 = vld [vmem:[%s227_s13] sm:$0xff]  ;;  %v617_v9 = vld [vmem:[%s227_s13 + $0x8] sm:$0xff]  ;;  %v618_v10 = vld [vmem:[%s227_s13 + $0x10] sm:$0xff]  ;;  %s241_s24 = scalar_lea.vmem %s828_s3, %s564_s21  ;;  %s245_s27 = scalar_lea.vmem %s829_s4, %s564_s21 }
  0x10   : > { %v619_v11 = vld [vmem:[%s227_s13 + $0x18] sm:$0xff] }
  0x11   : > { %343 = vmatpush.bf16.msra.mxu0 %v626_v1  ;;  %654 = vmatpush.bf16.msra.mxu1 %v626_v1 }
  0x12   : > { %655 = vmatpush.bf16.msra.mxu2 %v626_v1  ;;  %656 = vmatpush.bf16.msra.mxu3 %v626_v1 }
  0x15   : > { %344 = vmatpush.bf16.msra.mxu0 %v625_v2  ;;  %657 = vmatpush.bf16.msra.mxu1 %v625_v2 }
  0x16   : > { %658 = vmatpush.bf16.msra.mxu2 %v625_v2  ;;  %659 = vmatpush.bf16.msra.mxu3 %v625_v2 }
  0x19   : > { %345 = vmatpush.bf16.msra.mxu0 %v624_v3  ;;  %660 = vmatpush.bf16.msra.mxu1 %v624_v3 }
  0x1a   : > { %661 = vmatpush.bf16.msra.mxu2 %v624_v3  ;;  %662 = vmatpush.bf16.msra.mxu3 %v624_v3 }
  0x1d   : > { %346 = vmatpush.bf16.msra.mxu0 %v623_v4  ;;  %663 = vmatpush.bf16.msra.mxu1 %v623_v4 }
  0x1e   : > { %664 = vmatpush.bf16.msra.mxu2 %v623_v4  ;;  %665 = vmatpush.bf16.msra.mxu3 %v623_v4 }
  0x21   : > { %347 = vmatpush.bf16.msra.mxu0 %v622_v5  ;;  %666 = vmatpush.bf16.msra.mxu1 %v622_v5 }
  0x22   : > { %667 = vmatpush.bf16.msra.mxu2 %v622_v5  ;;  %668 = vmatpush.bf16.msra.mxu3 %v622_v5 }
  0x25   : > { %348 = vmatpush.bf16.msra.mxu0 %v621_v6  ;;  %669 = vmatpush.bf16.msra.mxu1 %v621_v6 }
  0x26   : > { %670 = vmatpush.bf16.msra.mxu2 %v621_v6  ;;  %671 = vmatpush.bf16.msra.mxu3 %v621_v6 }
  0x29   : > { %349 = vmatpush.bf16.msra.mxu0 %v620_v7  ;;  %672 = vmatpush.bf16.msra.mxu1 %v620_v7 }
  0x2a   : > { %673 = vmatpush.bf16.msra.mxu2 %v620_v7  ;;  %674 = vmatpush.bf16.msra.mxu3 %v620_v7 }
  0x2c   : > { %350 = vmatmul.bf16.vlgmr.msra.gmra.mxu0 %v616_v8  ;;  %355 = vmatmul.bf16.vlgmr.msra.gmra.mxu1 %v617_v9 }
  0x2d   : > { %360 = vmatmul.bf16.vlgmr.msra.gmra.mxu2 %v618_v10  ;;  %365 = vmatmul.bf16.vlgmr.msra.gmra.mxu3 %v619_v11 }
  0xa9   : > { %v351_v12 = vpop.f32.mrf.mxu0  ;;  %v356_v13 = vpop.f32.mrf.mxu1 }
  0xaa   : > { %v394_v16 = vmul.f32 %v351_v12, %v351_v12  ;;  %v396_v23 = vmul.f32 %v356_v13, %v356_v13 }
  0xb0   : > { %v361_v14 = vpop.f32.mrf.mxu2  ;;  %v366_v15 = vpop.f32.mrf.mxu3 }
  0xb1   : > { %v353_v17 = vpop.f32.mrf.mxu0  ;;  %v358_v18 = vpop.f32.mrf.mxu1  ;;  %v398_v29 = vmul.f32 %v361_v14, %v361_v14  ;;  %v400_v39 = vmul.f32 %v366_v15, %v366_v15 }
  0xb2   : > { %v631_v19 = vpack.c.bf16 %v353_v17, %v351_v12  ;;  %v387_v20 = vadd.f32 %v353_v17, %v351_v12  ;;  %v395_v21 = vmul.f32 %v353_v17, %v353_v17  ;;  %v636_v22 = vpack.c.bf16 %v358_v18, %v356_v13 }
  0xb3   : > { %v397_v27 = vmul.f32 %v358_v18, %v358_v18 }
  0xb4   : > { %632 = vst [vmem:[%s802_s20] sm:$0xff] %v631_v19   ;;  %v402_v24 = vadd.f32 %v395_v21, %v394_v16  ;;  %v388_v25 = vadd.f32 %v387_v20, %v356_v13 }
  0xb5   : > { %648 = vst [vmem:[%s802_s20 + $0x8] sm:$0xff] %v636_v22  }
  0xb6   : > { %v389_v26 = vadd.f32 %v388_v25, %v358_v18  ;;  %v403_v28 = vadd.f32 %v402_v24, %v396_v23 }
  0xb8   : > { %v404_v30 = vadd.f32 %v403_v28, %v397_v27  ;;  %v363_v31 = vpop.f32.mrf.mxu2  ;;  %v390_v32 = vadd.f32 %v389_v26, %v361_v14  ;;  %v368_v33 = vpop.f32.mrf.mxu3 }
  0xb9   : > { %v641_v34 = vpack.c.bf16 %v363_v31, %v361_v14  ;;  %v646_v35 = vpack.c.bf16 %v368_v33, %v366_v15  ;;  %v399_v37 = vmul.f32 %v363_v31, %v363_v31  ;;  %v401_v43 = vmul.f32 %v368_v33, %v368_v33 }
  0xba   : > { %v391_v36 = vadd.f32 %v390_v32, %v363_v31  ;;  %v405_v38 = vadd.f32 %v404_v30, %v398_v29 }
  0xbb   : > { %649 = vst [vmem:[%s802_s20 + $0x10] sm:$0xff] %v641_v34  }
  0xbc   : > { %v406_v40 = vadd.f32 %v405_v38, %v399_v37  ;;  %650 = vst [vmem:[%s802_s20 + $0x18] sm:$0xff] %v646_v35   ;;  %v392_v41 = vadd.f32 %v391_v36, %v366_v15 }
  0xbe   : > { %v393_v42 = vadd.f32 %v392_v41, %v368_v33  ;;  %v407_v44 = vadd.f32 %v406_v40, %v400_v39 }
  0xc0   : > { %v408_v45 = vadd.f32 %v407_v44, %v401_v43  ;;  %413 = vst [vmem:[%s241_s24] sm:$0xff] %v393_v42 }
  0xc2   : > { %414 = vst [vmem:[%s245_s27] sm:$0xff] %v408_v45 }
  0xc3 PF: > { %s15_s17 = sadd.s32 1, %s721_s17   ;;  %s830_s15 = smov %s717_s16 }
  0xc4   : > { %p12_p6 = scmp.ge.s32.totalorder %s15_s17, 4   ;;  %s831_s16 = smov %s833_s18 }
  0xc6   :  { %14 = sbr.rel (!%p12_p6) target bundleno = 2 (0x2), region = 90 }

// kernel: resnet_block_forward.9
= control target key start
LH: loop header
LB: loop body
LE: loop exit
PB: predicated region body
PF: predicated region fallthrough
CT: control target
= control target key end

     0   :  { %s586_s21 = smov 0   ;;  %s681_s0 = inlined_call_operand.vmem [shape: bf16[128,128], index: 0, kind: input, shape index: {}]   ;;  %s682_s1 = inlined_call_operand.vmem [shape: f32[1,128], index: 1, kind: input, shape index: {}]   ;;  %s683_s2 = inlined_call_operand.vmem [shape: f32[1,128], index: 2, kind: input, shape index: {}]   ;;  %s684_s3 = inlined_call_operand.vmem [shape: bf16[128,128], index: 3, kind: input, shape index: {}]   ;;  %s685_s4 = inlined_call_operand.vmem [shape: f32[1,128], index: 4, kind: input, shape index: {}]   ;;  %s686_s5 = inlined_call_operand.vmem [shape: f32[1,128], index: 5, kind: input, shape index: {}]   ;;  %s687_s6 = inlined_call_operand.vmem [shape: bf16[128,128], index: 6, kind: output, shape index: {}]  }
   0x1 LB: > { %s457_s22 = sadd.s32 4294967295, %s549_s21   ;;  %p461_p0 = scmp.ge.s32.totalorder %s549_s21, 1  ;;  %s549_s21 = sphi %s586_s21, %s16_s21  }
   0x2   : > { %p224_p1 = scmp.lt.s32.totalorder %s549_s21, 3 }
   0x4   : > { %p225_p2 = pnand %p461_p0, %p224_p1 }
   0x5   : > { %s462_s23 = sshll.u32 (!%p225_p2), %s457_s22, 3 }
   0x6   : > { %228 = sbr.rel (%p225_p2) target bundleno = 40 (0x28), region = 44  ;;  %p260_p3 = scmp.lt.s32.totalorder (!%p225_p2), %s462_s23, 15 }
   0xb   : > { %s689_s23 = smov (!%p260_p3, %s462_s23), 15  ;;  %v611_v0 = vld [vmem:[%s682_s1] ss:$0 sm:$0xff] }
   0xc   : > { %s594_s24 = sshll.u32 %s689_s23, 2  ;;  %v616_v1 = vld [vmem:[%s685_s4] ss:$0 sm:$0xff] }
   0xd   : > { %s600_s27 = scalar_lea.vmem %s681_s0, %s594_s24  ;;  %s606_s30 = scalar_lea.vmem %s684_s3, %s594_s24  ;;  %v624_v7 = vld [vmem:[%s683_s2] ss:$0 sm:$0xff] }
   0xe   : > { %v471_v2 = vld [vmem:[%s600_s27] sm:$0xff]   ;;  %v522_v4 = vld [vmem:[%s600_s27 + $0x8] sm:$0xff]   ;;  %v523_v24 = vld [vmem:[%s600_s27 + $0x10] sm:$0xff]   ;;  %s657_s17 = scalar_lea.vmem %s687_s6, %s594_s24 }
   0xf   : > { %v487_v3 = vld [vmem:[%s606_s30] sm:$0xff]   ;;  %v472_v5 = vunpack.c.l.bf16 %v471_v2  ;;  %v473_v6 = vunpack.c.h.bf16 %v471_v2  ;;  %v525_v11 = vld [vmem:[%s606_s30 + $0x8] sm:$0xff]   ;;  %v476_v12 = vunpack.c.l.bf16 %v522_v4  ;;  %v477_v13 = vunpack.c.h.bf16 %v522_v4  ;;  %v526_v29 = vld [vmem:[%s606_s30 + $0x10] sm:$0xff]  }
  0x10   : > { %v488_v8 = vunpack.c.l.bf16 %v487_v3  ;;  %v489_v9 = vunpack.c.h.bf16 %v487_v3  ;;  %v629_v10 = vld [vmem:[%s686_s5] ss:$0 sm:$0xff]  ;;  %v492_v14 = vunpack.c.l.bf16 %v525_v11  ;;  %v493_v15 = vunpack.c.h.bf16 %v525_v11  ;;  %v524_v42 = vld [vmem:[%s600_s27 + $0x18] sm:$0xff]  }
  0x11   : > { %v297_v16 = vmul.f32 %v611_v0, %v472_v5  ;;  %v298_v17 = vmul.f32 %v611_v0, %v473_v6  ;;  %v299_v20 = vmul.f32 %v611_v0, %v476_v12  ;;  %v300_v21 = vmul.f32 %v611_v0, %v477_v13  ;;  %v527_v51 = vld [vmem:[%s606_s30 + $0x18] sm:$0xff]  }
  0x12   : > { %v337_v18 = vmul.f32 %v616_v1, %v488_v8  ;;  %v338_v19 = vmul.f32 %v616_v1, %v489_v9  ;;  %v339_v22 = vmul.f32 %v616_v1, %v492_v14  ;;  %v340_v23 = vmul.f32 %v616_v1, %v493_v15 }
  0x13   : > { %v309_v25 = vadd.f32 %v624_v7, %v297_v16  ;;  %v310_v26 = vadd.f32 %v624_v7, %v298_v17  ;;  %v311_v30 = vadd.f32 %v624_v7, %v299_v20  ;;  %v312_v31 = vadd.f32 %v624_v7, %v300_v21 }
  0x14   : > { %v349_v27 = vadd.f32 %v629_v10, %v337_v18  ;;  %v350_v28 = vadd.f32 %v629_v10, %v338_v19  ;;  %v351_v32 = vadd.f32 %v629_v10, %v339_v22  ;;  %v352_v33 = vadd.f32 %v629_v10, %v340_v23 }
  0x15   : > { %v480_v36 = vunpack.c.l.bf16 %v523_v24  ;;  %v481_v37 = vunpack.c.h.bf16 %v523_v24  ;;  %v496_v40 = vunpack.c.l.bf16 %v526_v29  ;;  %v497_v41 = vunpack.c.h.bf16 %v526_v29 }
  0x16   : > { %v357_v34 = vadd.f32 %v349_v27, %v309_v25  ;;  %v358_v35 = vadd.f32 %v350_v28, %v310_v26  ;;  %v359_v38 = vadd.f32 %v351_v32, %v311_v30  ;;  %v360_v39 = vadd.f32 %v352_v33, %v312_v31 }
  0x17   : > { %v301_v45 = vmul.f32 %v611_v0, %v480_v36  ;;  %v302_v46 = vmul.f32 %v611_v0, %v481_v37  ;;  %v341_v49 = vmul.f32 %v616_v1, %v496_v40  ;;  %v342_v50 = vmul.f32 %v616_v1, %v497_v41 }
  0x18   : > { %v365_v43 = vmax.f32 %v357_v34, 0.0  ;;  %v366_v44 = vmax.f32 %v358_v35, 0.0  ;;  %v367_v47 = vmax.f32 %v359_v38, 0.0  ;;  %v368_v48 = vmax.f32 %v360_v39, 0.0 }
  0x19   : > { %v313_v53 = vadd.f32 %v624_v7, %v301_v45  ;;  %v314_v54 = vadd.f32 %v624_v7, %v302_v46  ;;  %v484_v55 = vunpack.c.l.bf16 %v524_v42  ;;  %v353_v57 = vadd.f32 %v629_v10, %v341_v49 }
  0x1a   : > { %v505_v52 = vpack.c.bf16 %v366_v44, %v365_v43  ;;  %v510_v56 = vpack.c.bf16 %v368_v48, %v367_v47  ;;  %v354_v58 = vadd.f32 %v629_v10, %v342_v50  ;;  %v485_v59 = vunpack.c.h.bf16 %v524_v42 }
  0x1b   : > { %v303_v60 = vmul.f32 %v611_v0, %v484_v55  ;;  %v500_v61 = vunpack.c.l.bf16 %v527_v51  ;;  %v501_v62 = vunpack.c.h.bf16 %v527_v51  ;;  %v361_v63 = vadd.f32 %v353_v57, %v313_v53 }
  0x1c   : > { %506 = vst [vmem:[%s657_s17] sm:$0xff] %v505_v52   ;;  %v362_v2 = vadd.f32 %v354_v58, %v314_v54  ;;  %v304_v3 = vmul.f32 %v611_v0, %v485_v59 }
  0x1d   : > { %528 = vst [vmem:[%s657_s17 + $0x8] sm:$0xff] %v510_v56   ;;  %v315_v4 = vadd.f32 %v624_v7, %v303_v60  ;;  %v343_v5 = vmul.f32 %v616_v1, %v500_v61  ;;  %v344_v6 = vmul.f32 %v616_v1, %v501_v62  ;;  %v369_v8 = vmax.f32 %v361_v63, 0.0 }
  0x1e   : > { %v370_v9 = vmax.f32 %v362_v2, 0.0  ;;  %v316_v11 = vadd.f32 %v624_v7, %v304_v3 }
  0x1f   : > { %v355_v12 = vadd.f32 %v629_v10, %v343_v5  ;;  %v356_v13 = vadd.f32 %v629_v10, %v344_v6 }
  0x20   : > { %v515_v14 = vpack.c.bf16 %v370_v9, %v369_v8 }
  0x21   : > { %v363_v15 = vadd.f32 %v355_v12, %v315_v4  ;;  %v364_v16 = vadd.f32 %v356_v13, %v316_v11 }
  0x22   : > { %529 = vst [vmem:[%s657_s17 + $0x10] sm:$0xff] %v515_v14  }
  0x23   : > { %v371_v0 = vmax.f32 %v363_v15, 0.0  ;;  %v372_v17 = vmax.f32 %v364_v16, 0.0 }
  0x25   : > { %v520_v18 = vpack.c.bf16 %v372_v17, %v371_v0 }
  0x27   : > { %530 = vst [vmem:[%s657_s17 + $0x18] sm:$0xff] %v520_v18  }
  0x28 PF: > { %s16_s21 = sadd.s32 1, %s549_s21  }
  0x29   : > { %p13_p4 = scmp.ge.s32.totalorder %s16_s21, 4  }
  0x2b   :  { %15 = sbr.rel (!%p13_p4) target bundleno = 1 (0x1), region = 77 }

</bundles_post_ra>
